<compile_context>
chip_gen: v7x
topology: tpu7x:2x2x1
jax: 0.10.0
libtpu: 0.0.40
codegen_flags: <defaults>
</compile_context>

<pallas_src>
import functools

import jax
import jax.numpy as jnp
from jax.experimental import pallas as pl
from jax.experimental.pallas import tpu as pltpu

_LANE = 128      # lane width: output (last) dim of W padded to this
_SUBLANE = 8     # sublane width: contraction dim of W padded to this (f32)


def _round_up(n: int, m: int) -> int:
    return ((n + m - 1) // m) * m


def _fused_fnn_kernel(x_ref, w_ref, b_ref, o_ref, *, fan_ins, out_size):
    """Entire FNN forward on one VMEM-resident set of tiles.

    x_ref: (B, Din)       unpadded input activations
    w_ref: (L, Kp, Dp)    stacked weights, (in, out) layout; Kp = mult of 8,
                          Dp = 128-lane-dense; zero-padded
    b_ref: (L, 1, Dp)     biases, broadcast over sublanes in the epilogue
    o_ref: (B, out_size)  true-shaped output
    """
    h = x_ref[...]
    num_linear = len(fan_ins)
    for i in range(num_linear):              # static trip count -> unrolled
        k = fan_ins[i]                       # static per-layer fan-in
        y = jnp.dot(h[:, :k], w_ref[i, :k, :],
                    preferred_element_type=jnp.float32)
        y = y + b_ref[i]                     # (1, Dp) sublane-broadcast add
        if i < num_linear - 1:
            y = jnp.maximum(y, 0.0)          # ReLU on every layer but the last
        h = y
    o_ref[...] = h[:, :out_size].astype(o_ref.dtype)


def init_fnn_params(key, input_size, hidden_size, output_size, num_layers):
    """nn.Linear-style init (uniform +/- 1/sqrt(fan_in)); W stored (in, out)."""
    dims = [input_size] + [hidden_size] * num_layers + [output_size]
    params = []
    for i in range(len(dims) - 1):
        fan_in, fan_out = dims[i], dims[i + 1]
        key, kw, kb = jax.random.split(key, 3)
        bound = 1.0 / jnp.sqrt(jnp.float32(fan_in))
        w = jax.random.uniform(kw, (fan_in, fan_out), jnp.float32, -bound, bound)
        b = jax.random.uniform(kb, (fan_out,), jnp.float32, -bound, bound)
        params.append((w, b))
    return params


def pack_fnn_params(params):
    """One-time padding/stacking: W lane-dense to 128, K only to a mult of 8."""
    fan_ins = tuple(w.shape[0] for w, _ in params)
    fan_outs = [w.shape[1] for w, _ in params]
    kp = _round_up(max(fan_ins), _SUBLANE)
    dp = _round_up(max(fan_outs), _LANE)
    num_linear = len(params)

    wp = jnp.zeros((num_linear, kp, dp), jnp.float32)
    bp = jnp.zeros((num_linear, 1, dp), jnp.float32)
    for i, (w, b) in enumerate(params):
        din, dout = w.shape
        wp = wp.at[i, :din, :dout].set(w)
        bp = bp.at[i, 0, :dout].set(b)
    out_size = params[-1][0].shape[1]
    return wp, bp, fan_ins, out_size


@functools.partial(jax.jit, static_argnames=("fan_ins", "out_size"))
def fnn_forward(wp, bp, x, fan_ins, out_size):
    """Fused forward: single pallas_call, no wrapper-side pad/slice ops."""
    batch = x.shape[0]
    kernel = functools.partial(_fused_fnn_kernel,
                               fan_ins=fan_ins, out_size=out_size)
    return pl.pallas_call(
        kernel,
        out_shape=jax.ShapeDtypeStruct((batch, out_size), jnp.float32),
        # Single grid point: whole-array VMEM residency, no pipelining needed.
        in_specs=[
            pl.BlockSpec(memory_space=pltpu.MemorySpace.VMEM),  # x (unpadded)
            pl.BlockSpec(memory_space=pltpu.MemorySpace.VMEM),  # stacked W
            pl.BlockSpec(memory_space=pltpu.MemorySpace.VMEM),  # stacked b
        ],
        out_specs=pl.BlockSpec(memory_space=pltpu.MemorySpace.VMEM),
    )(x.astype(jnp.float32), wp, bp)


def fnn_reference(params, x):
    """Pure-JAX reference matching FNNModel.forward."""
    n = len(params)
    for i, (w, b) in enumerate(params):
        x = x @ w + b
        if i < n - 1:
            x = jnp.maximum(x, 0.0)
    return x


if __name__ == "__main__":
    # Small shapes consistent with the module's forward pass.
    batch = 8
    input_size = 32
    hidden_size = 64
    output_size = 16
    num_layers = 3  # -> 3 Linear+ReLU stages followed by the output Linear

    key = jax.random.PRNGKey(0)
    key, kx = jax.random.split(key)
    x = jax.random.normal(kx, (batch, input_size), jnp.float32)

    params = init_fnn_params(key, input_size, hidden_size, output_size, num_layers)
    wp, bp, fan_ins, out_size = pack_fnn_params(params)

    out = fnn_forward(wp, bp, x, fan_ins, out_size)
    out = jax.block_until_ready(out)

    ref = fnn_reference(params, x)
    assert out.shape == (batch, output_size), out.shape
    assert jnp.allclose(out, ref, atol=1e-5, rtol=1e-5), "mismatch vs JAX reference"

    print("KERNEL_OK")
</pallas_src>

<mosaic_0001>
module attributes {stable_mosaic.version = 11 : i64} {
  func.func @_fused_fnn_kernel(%arg0: memref<8x32xf32, #tpu.memory_space<vmem>>, %arg1: memref<4x64x128xf32, #tpu.memory_space<vmem>>, %arg2: memref<4x1x128xf32, #tpu.memory_space<vmem>>, %arg3: memref<8x16xf32, #tpu.memory_space<vmem>>) attributes {dimension_semantics = [], scalar_prefetch = 0 : i64, scratch_operands = 0 : i64, tpu.core_type = #tpu.core_type<tc>} {
    %c0 = arith.constant 0 : index
    %c0_0 = arith.constant 0 : index
    %0 = vector.load %arg0[%c0, %c0_0] : memref<8x32xf32, #tpu.memory_space<vmem>>, vector<8x32xf32>
    %c0_1 = arith.constant 0 : index
    %c0_2 = arith.constant 0 : index
    %c0_3 = arith.constant 0 : index
    %1 = vector.load %arg1[%c0_1, %c0_2, %c0_3] : memref<4x64x128xf32, #tpu.memory_space<vmem>>, vector<1x32x128xf32>
    %2 = vector.shape_cast %1 : vector<1x32x128xf32> to vector<32x128xf32>
    %cst = arith.constant dense<0.000000e+00> : vector<8x128xf32>
    %3 = tpu.matmul %0, %2, %cst {dimension_numbers = #tpu.dot_dimension_numbers<[1], [0], [0], [1], [0, 0, 1, 1], [], []>} : vector<8x32xf32>, vector<32x128xf32>, vector<8x128xf32> -> vector<8x128xf32>
    %c0_4 = arith.constant 0 : index
    %c0_5 = arith.constant 0 : index
    %c0_6 = arith.constant 0 : index
    %4 = vector.load %arg2[%c0_4, %c0_5, %c0_6] : memref<4x1x128xf32, #tpu.memory_space<vmem>>, vector<1x1x128xf32>
    %5 = vector.shape_cast %4 : vector<1x1x128xf32> to vector<1x128xf32>
    %6 = vector.broadcast %5 : vector<1x128xf32> to vector<8x128xf32>
    %7 = arith.addf %3, %6 : vector<8x128xf32>
    %cst_7 = arith.constant 0.000000e+00 : f32
    %8 = vector.broadcast %cst_7 : f32 to vector<8x128xf32>
    %9 = arith.maximumf %7, %8 : vector<8x128xf32>
    %10 = vector.extract_strided_slice %9 {offsets = [0, 0], sizes = [8, 64], strides = [1, 1]} : vector<8x128xf32> to vector<8x64xf32>
    %c1 = arith.constant 1 : index
    %c0_8 = arith.constant 0 : index
    %c0_9 = arith.constant 0 : index
    %11 = vector.load %arg1[%c1, %c0_8, %c0_9] : memref<4x64x128xf32, #tpu.memory_space<vmem>>, vector<1x64x128xf32>
    %12 = vector.shape_cast %11 : vector<1x64x128xf32> to vector<64x128xf32>
    %cst_10 = arith.constant dense<0.000000e+00> : vector<8x128xf32>
    %13 = tpu.matmul %10, %12, %cst_10 {dimension_numbers = #tpu.dot_dimension_numbers<[1], [0], [0], [1], [0, 0, 1, 1], [], []>} : vector<8x64xf32>, vector<64x128xf32>, vector<8x128xf32> -> vector<8x128xf32>
    %c1_11 = arith.constant 1 : index
    %c0_12 = arith.constant 0 : index
    %c0_13 = arith.constant 0 : index
    %14 = vector.load %arg2[%c1_11, %c0_12, %c0_13] : memref<4x1x128xf32, #tpu.memory_space<vmem>>, vector<1x1x128xf32>
    %15 = vector.shape_cast %14 : vector<1x1x128xf32> to vector<1x128xf32>
    %16 = vector.broadcast %15 : vector<1x128xf32> to vector<8x128xf32>
    %17 = arith.addf %13, %16 : vector<8x128xf32>
    %cst_14 = arith.constant 0.000000e+00 : f32
    %18 = vector.broadcast %cst_14 : f32 to vector<8x128xf32>
    %19 = arith.maximumf %17, %18 : vector<8x128xf32>
    %20 = vector.extract_strided_slice %19 {offsets = [0, 0], sizes = [8, 64], strides = [1, 1]} : vector<8x128xf32> to vector<8x64xf32>
    %c2 = arith.constant 2 : index
    %c0_15 = arith.constant 0 : index
    %c0_16 = arith.constant 0 : index
    %21 = vector.load %arg1[%c2, %c0_15, %c0_16] : memref<4x64x128xf32, #tpu.memory_space<vmem>>, vector<1x64x128xf32>
    %22 = vector.shape_cast %21 : vector<1x64x128xf32> to vector<64x128xf32>
    %cst_17 = arith.constant dense<0.000000e+00> : vector<8x128xf32>
    %23 = tpu.matmul %20, %22, %cst_17 {dimension_numbers = #tpu.dot_dimension_numbers<[1], [0], [0], [1], [0, 0, 1, 1], [], []>} : vector<8x64xf32>, vector<64x128xf32>, vector<8x128xf32> -> vector<8x128xf32>
    %c2_18 = arith.constant 2 : index
    %c0_19 = arith.constant 0 : index
    %c0_20 = arith.constant 0 : index
    %24 = vector.load %arg2[%c2_18, %c0_19, %c0_20] : memref<4x1x128xf32, #tpu.memory_space<vmem>>, vector<1x1x128xf32>
    %25 = vector.shape_cast %24 : vector<1x1x128xf32> to vector<1x128xf32>
    %26 = vector.broadcast %25 : vector<1x128xf32> to vector<8x128xf32>
    %27 = arith.addf %23, %26 : vector<8x128xf32>
    %cst_21 = arith.constant 0.000000e+00 : f32
    %28 = vector.broadcast %cst_21 : f32 to vector<8x128xf32>
    %29 = arith.maximumf %27, %28 : vector<8x128xf32>
    %30 = vector.extract_strided_slice %29 {offsets = [0, 0], sizes = [8, 64], strides = [1, 1]} : vector<8x128xf32> to vector<8x64xf32>
    %c3 = arith.constant 3 : index
    %c0_22 = arith.constant 0 : index
    %c0_23 = arith.constant 0 : index
    %31 = vector.load %arg1[%c3, %c0_22, %c0_23] : memref<4x64x128xf32, #tpu.memory_space<vmem>>, vector<1x64x128xf32>
    %32 = vector.shape_cast %31 : vector<1x64x128xf32> to vector<64x128xf32>
    %cst_24 = arith.constant dense<0.000000e+00> : vector<8x128xf32>
    %33 = tpu.matmul %30, %32, %cst_24 {dimension_numbers = #tpu.dot_dimension_numbers<[1], [0], [0], [1], [0, 0, 1, 1], [], []>} : vector<8x64xf32>, vector<64x128xf32>, vector<8x128xf32> -> vector<8x128xf32>
    %c3_25 = arith.constant 3 : index
    %c0_26 = arith.constant 0 : index
    %c0_27 = arith.constant 0 : index
    %34 = vector.load %arg2[%c3_25, %c0_26, %c0_27] : memref<4x1x128xf32, #tpu.memory_space<vmem>>, vector<1x1x128xf32>
    %35 = vector.shape_cast %34 : vector<1x1x128xf32> to vector<1x128xf32>
    %36 = vector.broadcast %35 : vector<1x128xf32> to vector<8x128xf32>
    %37 = arith.addf %33, %36 : vector<8x128xf32>
    %38 = vector.extract_strided_slice %37 {offsets = [0, 0], sizes = [8, 16], strides = [1, 1]} : vector<8x128xf32> to vector<8x16xf32>
    %c0_28 = arith.constant 0 : index
    %c0_29 = arith.constant 0 : index
    %39 = vector.load %arg3[%c0_28, %c0_29] : memref<8x16xf32, #tpu.memory_space<vmem>>, vector<8x16xf32>
    tpu.vector_store %arg3[%c0_28, %c0_29], %38 {strides = array<i32>} : memref<8x16xf32, #tpu.memory_space<vmem>>, vector<8x16xf32>,
    return
  }
}

</mosaic_0001>

<bundles_post_ra>
// kernel: fnn_forward.1
= control target key start
LH: loop header
LB: loop body
LE: loop exit
PB: predicated region body
PF: predicated region fallthrough
CT: control target
= control target key end

     0   :  { %8 = vsyncpa [#allocation3], 0  ;;  %s787_s0 = inlined_call_operand.hbm [shape: f32[8,32], index: 0, kind: input, shape index: {}]   ;;  %s788_s1 = inlined_call_operand.hbm [shape: f32[4,64,128], index: 1, kind: input, shape index: {}]   ;;  %s789_s2 = inlined_call_operand.hbm [shape: f32[4,1,128], index: 2, kind: input, shape index: {}]   ;;  %s790_s3 = inlined_call_operand.hbm [shape: f32[8,16], index: 3, kind: output, shape index: {}]  }
   0x1   :  { %9 = vsyncpa [#allocation6], 0 }
   0x2   :  { %10 = vsyncpa [#allocation4], 0  ;;  %s687_s12 = smov [#allocation5]   ;;  %s593_s16 = scalar_lea.hbm %s788_s1, 4096 }
   0x3   :  { %s26_s13 = sshll.u32 %s687_s12, 4  ;;  %p594_p0 = scmp.ne.s32.totalorder %s788_s1, %s593_s16  ;;  %s27_s13 = int_to_ptr.vmem [resolvable:$true] %s26_s13 }
   0x4   :  { %p597_p1 = scmp.lt.u32.totalorder %s593_s16, %s788_s1 }
   0x6   :  { %p599_p2 = pnand %p597_p1, %p594_p0 }
   0x8   :  { %602 = shalt.err (!%p599_p2)
}
   0x9   :  { %s603_s21 = scalar_lea.vmem %s27_s13, 4096  ;;  %p608_p4 = scmp.lt.s32.totalorder %s27_s13, %s27_s13 }
   0xa   :  { %p604_p3 = scmp.ne.s32.totalorder %s27_s13, %s603_s21  ;;  %p609_p5 = scmp.lt.s32.totalorder %s603_s21, %s603_s21 }
   0xc   :  { %p610_p6 = por %p609_p5, %p608_p4 }
   0xe   :  { %p611_p7 = pnand %p610_p6, %p604_p3 }
  0x10   :  { %614 = shalt.err (!%p611_p7)
}
  0x11   :  { %s688_s22 = smov 128   ;;  %s689_s23 = smov 8  }
  0x12   :  { %32 = dma.hbm_to_vmem [thread:$0]  %s788_s1, 4096, %s27_s13, [#allocation6], %s688_s22, %s688_s22, %s689_s23  }
  0x13   :  { %s690_s26 = smov [#allocation2]   ;;  %s691_s28 = smov [#allocation7]  }
  0x14   :  { %s17_s27 = sshll.u32 %s690_s26, 4  ;;  %s38_s29 = sshll.u32 %s691_s28, 4  ;;  %s18_s27 = int_to_ptr.vmem [resolvable:$true] %s17_s27  ;;  %s39_s29 = int_to_ptr.vmem [resolvable:$true] %s38_s29 }
  0x15   :  { %s615_s5 = scalar_lea.hbm %s787_s0, 128 }
  0x16   :  { %p616_p8 = scmp.ne.s32.totalorder %s787_s0, %s615_s5  ;;  %p619_p9 = scmp.lt.u32.totalorder %s615_s5, %s787_s0 }
  0x18   :  { %p621_p10 = pnand %p619_p9, %p616_p8 }
  0x1a   :  { %624 = shalt.err (!%p621_p10)
}
  0x1b   :  { %s625_s1 = scalar_lea.vmem %s18_s27, 128  ;;  %p630_p12 = scmp.lt.s32.totalorder %s18_s27, %s18_s27 }
  0x1c   :  { %p626_p11 = scmp.ne.s32.totalorder %s18_s27, %s625_s1  ;;  %p631_p13 = scmp.lt.s32.totalorder %s625_s1, %s625_s1 }
  0x1e   :  { %p632_p0 = por %p631_p13, %p630_p12 }
  0x20   :  { %p633_p1 = pnand %p632_p0, %p626_p11 }
  0x22   :  { %636 = shalt.err (!%p633_p1)
}
  0x23   :  { %20 = dma.hbm_to_vmem [thread:$0]  %s787_s0, 128, %s18_s27, [#allocation3]  }
  0x24   :  { %s637_s14 = scalar_lea.hbm %s789_s2, 64 }
  0x25   :  { %p638_p2 = scmp.ne.s32.totalorder %s789_s2, %s637_s14  ;;  %p641_p3 = scmp.lt.u32.totalorder %s637_s14, %s789_s2 }
  0x27   :  { %p643_p4 = pnand %p641_p3, %p638_p2 }
  0x29   :  { %646 = shalt.err (!%p643_p4)
}
  0x2a   :  { %s647_s19 = scalar_lea.vmem %s39_s29, 64  ;;  %p652_p6 = scmp.lt.s32.totalorder %s39_s29, %s39_s29 }
  0x2b   :  { %p648_p5 = scmp.ne.s32.totalorder %s39_s29, %s647_s19  ;;  %p653_p7 = scmp.lt.s32.totalorder %s647_s19, %s647_s19 }
  0x2d   :  { %p654_p8 = por %p653_p7, %p652_p6 }
  0x2f   :  { %p655_p9 = pnand %p654_p8, %p648_p5 }
  0x31   :  { %658 = shalt.err (!%p655_p9)
}
  0x32   :  { %s692_s0 = smov 16   ;;  %s693_s20 = smov 1  }
  0x33   :  { %44 = dma.hbm_to_vmem [thread:$0]  %s789_s2, 64, %s39_s29, [#allocation6], %s692_s0, %s692_s0, %s693_s20  }
  0x34   :  { %681 = dma.done.wait [#allocation3], 128  }
  0x35   :  { %682 = vsyncadd [#allocation3], 4294967168 }
  0x36   :  { %683 = dma.done.wait [#allocation6], 4160  }
  0x37   :  { %684 = vsyncadd [#allocation6], 4294963136  ;;  %v694_v0 = vmov 0.0|0.0   ;;  %vm695_vm0 = vmmov 0   ;;  %v696_v1 = vmov 0.0   ;;  %v55_v2 = vld [vmem:[#allocation5] sm:$0xff] }
  0x38   :  { %540 = vmatprep.subr.bf16.mxu0 %v694_v0  ;;  %480 = vmatprep.mubr.msk.f32.mxu0 %vm695_vm0, %v696_v1  ;;  %v56_v3 = vld [vmem:[#allocation5 + $0x8] sm:$0xff]  ;;  %v57_v4 = vld [vmem:[#allocation5 + $0x10] sm:$0xff]  ;;  %v58_v6 = vld [vmem:[#allocation5 + $0x18] sm:$0xff]  ;;  %vm66_vm1 = vcmask 261120   ;;  %vm158_vm2 = vcmask 523264   ;;  %s697_s2 = smov [#allocation8]  }
  0x39   :  { %546 = vmatprep.subr.bf16.mxu1 %v694_v0  ;;  %499 = vmatprep.mubr.msk.f32.mxu1 %vm695_vm0, %v696_v1  ;;  %v541_v5 = vpack.c.bf16 %v56_v3, %v55_v2  ;;  %v142_v7 = vld [vmem:[#allocation5 + $0x40] sm:$0xff]  ;;  %v143_v8 = vld [vmem:[#allocation5 + $0x48] sm:$0xff]  ;;  %v144_v9 = vld [vmem:[#allocation5 + $0x50] sm:$0xff]  ;;  %v544_v11 = vpack.c.bf16 %v58_v6, %v57_v4  ;;  %s422_s23 = sshll.u32 %s697_s2, 4  ;;  %vm414_vm3 = vcmask 130048   ;;  %s423_s23 = int_to_ptr.vmem [resolvable:$true] %s422_s23 }
  0x3a   :  { %v145_v10 = vld [vmem:[#allocation5 + $0x58] sm:$0xff]  ;;  %v547_v12 = vpack.c.bf16 %v143_v8, %v142_v7  ;;  %v146_v14 = vld [vmem:[#allocation5 + $0x60] sm:$0xff]  ;;  %v147_v15 = vld [vmem:[#allocation5 + $0x68] sm:$0xff]  ;;  %s659_s24 = scalar_lea.vmem %s423_s23, 128  ;;  %p664_p11 = scmp.lt.s32.totalorder %s423_s23, %s423_s23 }
  0x3b   :  { %542 = vmatpush3.bf16.msra.mxu0 %v541_v5  ;;  %v550_v13 = vpack.c.bf16 %v145_v10, %v144_v9  ;;  %v54_v16 = vld [vmem:[#allocation2] sm:$0xff]  ;;  %v553_v17 = vpack.c.bf16 %v147_v15, %v146_v14  ;;  %v148_v18 = vld [vmem:[#allocation5 + $0x70] sm:$0xff]  ;;  %v234_v21 = vld [vmem:[#allocation5 + $0x80] sm:$0xff]  ;;  %p660_p10 = scmp.ne.s32.totalorder %s423_s23, %s659_s24  ;;  %p665_p12 = scmp.lt.s32.totalorder %s659_s24, %s659_s24 }
  0x3c   :  { %543 = vmatprep.subr.bf16.mxu0 %v694_v0  ;;  %548 = vmatpush3.bf16.msra.mxu1 %v547_v12  ;;  %v149_v19 = vld [vmem:[#allocation5 + $0x78] sm:$0xff]  ;;  %v235_v22 = vld [vmem:[#allocation5 + $0x88] sm:$0xff]  ;;  %v236_v23 = vld [vmem:[#allocation5 + $0x90] sm:$0xff] }
  0x3d   :  { %549 = vmatprep.subr.bf16.mxu1 %v694_v0  ;;  %v556_v20 = vpack.c.bf16 %v149_v19, %v148_v18  ;;  %v559_v24 = vpack.c.bf16 %v235_v22, %v234_v21  ;;  %v237_v25 = vld [vmem:[#allocation5 + $0x98] sm:$0xff]  ;;  %v238_v27 = vld [vmem:[#allocation5 + $0xa0] sm:$0xff]  ;;  %v239_v28 = vld [vmem:[#allocation5 + $0xa8] sm:$0xff]  ;;  %p666_p13 = por %p665_p12, %p664_p11 }
  0x3e   :  { %v562_v26 = vpack.c.bf16 %v237_v25, %v236_v23  ;;  %v565_v29 = vpack.c.bf16 %v239_v28, %v238_v27  ;;  %v432_v30 = vld [vmem:[#allocation7] ss:$0 sm:$0xff]  ;;  %v240_v35 = vld [vmem:[#allocation5 + $0xb0] sm:$0xff]  ;;  %v241_v36 = vld [vmem:[#allocation5 + $0xb8] sm:$0xff] }
  0x3f   :  { %545 = vmatpush3.bf16.msra.mxu0 %v544_v11  ;;  %v568_v37 = vpack.c.bf16 %v241_v36, %v240_v35  ;;  %v325_v38 = vld [vmem:[#allocation5 + $0xc0] sm:$0xff]  ;;  %v326_v39 = vld [vmem:[#allocation5 + $0xc8] sm:$0xff]  ;;  %v327_v40 = vld [vmem:[#allocation5 + $0xd0] sm:$0xff]  ;;  %p667_p0 = pnand %p666_p13, %p660_p10 }
  0x40   :  { %558 = vmatprep.subr.bf16.mxu0 %v694_v0  ;;  %551 = vmatpush3.bf16.msra.mxu1 %v550_v13  ;;  %v571_v41 = vpack.c.bf16 %v326_v39, %v325_v38  ;;  %v328_v42 = vld [vmem:[#allocation5 + $0xd8] sm:$0xff]  ;;  %v329_v44 = vld [vmem:[#allocation5 + $0xe0] sm:$0xff]  ;;  %v330_v45 = vld [vmem:[#allocation5 + $0xe8] sm:$0xff] }
  0x41   :  { %552 = vmatprep.subr.bf16.mxu1 %v694_v0  ;;  %v574_v43 = vpack.c.bf16 %v328_v42, %v327_v40  ;;  %v577_v46 = vpack.c.bf16 %v330_v45, %v329_v44  ;;  %v434_v47 = vld [vmem:[#allocation7 + $0x1] ss:$0 sm:$0xff]  ;;  %v331_v52 = vld [vmem:[#allocation5 + $0xf0] sm:$0xff]  ;;  %v332_v53 = vld [vmem:[#allocation5 + $0xf8] sm:$0xff] }
  0x42   :  { %481 = vmatmul.mubr.msk.f32.vlgmr.msra.gmra.mrb[0].mxu0 %vm66_vm1, %v54_v16  ;;  %v580_v54 = vpack.c.bf16 %v332_v53, %v331_v52  ;;  %v436_v55 = vld [vmem:[#allocation7 + $0x2] ss:$0 sm:$0xff]  ;;  %v438_v60 = vld [vmem:[#allocation7 + $0x3] ss:$0 sm:$0xff] }
  0x43   :  { %518 = vmatprep.mubr.msk.f32.mxu0 %vm695_vm0, %v696_v1  ;;  %560 = vmatpush3.bf16.msra.mxu0 %v559_v24 }
  0x44   :  { %554 = vmatpush3.bf16.msra.mxu1 %v553_v17  ;;  %561 = vmatprep.subr.bf16.mxu0 %v694_v0 }
  0x45   :  { %555 = vmatprep.subr.bf16.mxu1 %v694_v0 }
  0x47   :  { %563 = vmatpush3.bf16.msra.mxu0 %v562_v26 }
  0x48   :  { %557 = vmatpush3.bf16.msra.mxu1 %v556_v20  ;;  %564 = vmatprep.subr.bf16.mxu0 %v694_v0 }
  0x49   :  { %570 = vmatprep.subr.bf16.mxu1 %v694_v0 }
  0x4b   :  { %566 = vmatpush3.bf16.msra.mxu0 %v565_v29 }
  0x4c   :  { %567 = vmatprep.subr.bf16.mxu0 %v694_v0 }
  0x4f   :  { %569 = vmatpush3.bf16.msra.mxu0 %v568_v37 }
 0x115   :  { %v136_v31 = vpop.f32.mrb[0].mxu0 }
 0x116   :  { %v137_v32 = vadd.f32 %v432_v30, %v136_v31  ;;  %v482_v33 = vpop.f32.mrb[1].mxu0 }
 0x118   :  { %v140_v34 = vmax.f32 %v137_v32, 0.0 }
 0x11a   :  { %500 = vmatmul.mubr.msk.f32.vlgmr.msra.gmra.mrb[0].mxu1 %vm158_vm2, %v140_v34 }
 0x11b   :  { %537 = vmatprep.mubr.msk.f32.mxu1 %vm695_vm0, %v696_v1  ;;  %572 = vmatpush3.bf16.msra.mxu1 %v571_v41 }
 0x11c   :  { %573 = vmatprep.subr.bf16.mxu1 %v694_v0 }
 0x11f   :  { %575 = vmatpush3.bf16.msra.mxu1 %v574_v43 }
 0x120   :  { %576 = vmatprep.subr.bf16.mxu1 %v694_v0 }
 0x123   :  { %578 = vmatpush3.bf16.msra.mxu1 %v577_v46 }
 0x124   :  { %579 = vmatprep.subr.bf16.mxu1 %v694_v0 }
 0x127   :  { %581 = vmatpush3.bf16.msra.mxu1 %v580_v54 }
 0x1ed   :  { %v228_v48 = vpop.f32.mrb[0].mxu1 }
 0x1ee   :  { %v229_v49 = vadd.f32 %v434_v47, %v228_v48  ;;  %v501_v50 = vpop.f32.mrb[1].mxu1 }
 0x1f0   :  { %v232_v51 = vmax.f32 %v229_v49, 0.0 }
 0x1f2   :  { %519 = vmatmul.mubr.msk.f32.vlgmr.msra.gmra.mrb[2].mxu0 %vm158_vm2, %v232_v51 }
 0x2c5   :  { %v319_v56 = vpop.f32.mrb[2].mxu0 }
 0x2c6   :  { %v320_v57 = vadd.f32 %v436_v55, %v319_v56  ;;  %v520_v58 = vpop.f32.mrb[3].mxu0 }
 0x2c8   :  { %v323_v59 = vmax.f32 %v320_v57, 0.0 }
 0x2ca   :  { %538 = vmatmul.mubr.msk.f32.vlgmr.msra.gmra.mrb[2].mxu1 %vm158_vm2, %v323_v59 }
 0x39d   :  { %v410_v61 = vpop.f32.mrb[2].mxu1 }
 0x39e   :  { %v411_v62 = vadd.f32 %v438_v60, %v410_v61  ;;  %v539_v63 = vpop.f32.mrb[3].mxu1 }
 0x3a0   :  { %415 = vst.msk [vmem:[#allocation8] sm:$0xff] %vm414_vm3, %v411_v62 }
 0x3a1   :  { %670 = shalt.err (!%p667_p0)
}
 0x3a2   :  { %s671_s27 = scalar_lea.hbm %s790_s3, 128 }
 0x3a3   :  { %p672_p1 = scmp.ne.s32.totalorder %s790_s3, %s671_s27  ;;  %p675_p2 = scmp.lt.u32.totalorder %s671_s27, %s790_s3 }
 0x3a5   :  { %p677_p3 = pnand %p675_p2, %p672_p1 }
 0x3a7   :  { %680 = shalt.err (!%p677_p3)
}
 0x3a8   :  { %425 = dma.vmem_to_hbm [thread:$0]  %s423_s23, 128, %s790_s3, [#allocation4]  }
 0x3a9   :  { %685 = dma.done.wait [#allocation4], 128  }
 0x3aa   :  { %686 = vsyncadd [#allocation4], 4294967168 }
 0x3ab   :  { %429 = vsyncpa [#allocation3], 1 }
 0x3ac   :  { %430 = vsyncpa [#allocation6], 1 }
 0x3ad   :  { %431 = vsyncpa [#allocation4], 1 }

</bundles_post_ra>
